<compile_context>
chip_gen: v7x
topology: tpu7x:2x2x1
jax: 0.10.0
libtpu: 0.0.40
codegen_flags: <defaults>
</compile_context>

<pallas_src>
import functools

import jax
import jax.numpy as jnp
from jax import lax
from jax.experimental import pallas as pl
from jax.experimental.pallas import tpu as pltpu

KH, KW = 2, 2      # Conv2d kernel_size=2
PAD = 2            # Conv2d padding=2
EPS = 1e-5         # BatchNorm2d default eps


def convres_kernel(x_ref, wp_ref, o_ref, *, C, CO, Wp, L_pad, Nb):
    """Conv2d(k=2) as 4 per-tap MXU matmuls + bias + PReLU, channel-major.

    x_ref:  (Nb, C, Lp_pad)  BN-applied, zero-padded images; spatial flattened
                             row-major with row stride Wp, lane-padded to 128.
    wp_ref: (CO, K + 2)      packed [W_mat | conv_bias | prelu_alpha] where
                             W_mat[co, (kh*KW+kw)*C + c] = w[co, c, kh, kw].
    o_ref:  (Nb, CO, L_pad)  L_pad = round_up(Ho*Wp, 128); output keeps the
                             input row stride Wp (wrapper trims stride + pad).
    """
    K = KH * KW * C
    bias = wp_ref[:, K:K + 1]          # (CO, 1)
    alpha = wp_ref[:, K + 1:K + 2]     # (CO, 1)
    taps = [(kh, kw) for kh in range(KH) for kw in range(KW)]

    for nb in range(Nb):               # static, small unroll (Nb images / step)
        acc = None
        for t, (kh, kw) in enumerate(taps):
            off = kh * Wp + kw         # static flat offset of this tap
            xt = x_ref[nb, :, off:off + L_pad]        # (C, L_pad) ref-sliced tap
            wt = wp_ref[:, t * C:(t + 1) * C]         # (CO, C) tap weights
            p = jnp.dot(wt, xt, preferred_element_type=jnp.float32)
            acc = p if acc is None else acc + p
        acc = acc + bias
        # TODO(synk): nn.Dropout(0.3) is identity in eval mode; training-time RNG mask not implemented.
        o_ref[nb] = jnp.where(acc > 0, acc, alpha * acc).astype(o_ref.dtype)


@functools.partial(jax.jit, static_argnames=("num_grid_steps",))
def convres_forward(x_nchw, gamma, beta, run_mean, run_var, w_oihw, bias, alpha,
                    *, num_grid_steps=2):
    """ConvRes forward. x_nchw: (N, C, H, W) float32 -> (N, CO, H+3, W+3).

    num_grid_steps: target number of grid steps. 2 (default) keeps both
    TensorCores busy on v7x; on single-TC v5e/v6e 1 is marginally better.
    """
    N, C, H, W = x_nchw.shape
    CO = w_oihw.shape[0]
    Hp, Wp = H + 2 * PAD, W + 2 * PAD
    Ho, Wo = Hp - KH + 1, Wp - KW + 1
    L = Ho * Wp                                   # flat output length (row stride Wp)
    L_pad = ((L + 127) // 128) * 128              # lane-dense output slab
    max_off = (KH - 1) * Wp + (KW - 1)            # largest tap offset
    Lp_pad = ((max_off + L_pad + 127) // 128) * 128   # flat input length, 128-aligned
    K = KH * KW * C

    # Grid sizing: G steps of Nb images each (batch padded to G*Nb with zeros).
    G = max(1, min(N, num_grid_steps))
    Nb = -(-N // G)
    Npad = G * Nb

    # Fold BN running stats into scale/shift; apply BEFORE zero-padding so the
    # conv's zero padding stays exactly zero (matches PyTorch BN -> conv(pad)).
    scale = gamma / jnp.sqrt(run_var + EPS)
    shift = beta - run_mean * scale
    xb = x_nchw * scale[None, :, None, None] + shift[None, :, None, None]

    # Zero-pad batch to Npad and spatial by PAD, flatten spatial, pad the flat
    # axis to Lp_pad (extra zeros only feed garbage/trimmed output positions).
    x_pad = jnp.pad(xb, ((0, Npad - N), (0, 0), (PAD, PAD), (PAD, PAD)))
    x_flat = x_pad.reshape(Npad, C, Hp * Wp)
    x_flat = jnp.pad(x_flat, ((0, 0), (0, 0), (0, Lp_pad - Hp * Wp)))

    # Pack OIHW weights tap-major / channel-minor plus conv bias and PReLU
    # alpha into one small parameter slab (single constant-index DMA).
    w_mat = jnp.transpose(w_oihw, (0, 2, 3, 1)).reshape(CO, K)
    alpha_arr = jnp.asarray(alpha, jnp.float32).reshape(-1)
    if alpha_arr.shape[0] == 1:
        alpha_col = jnp.broadcast_to(alpha_arr.reshape(1, 1), (CO, 1))
    elif alpha_arr.shape[0] == CO:
        alpha_col = alpha_arr.reshape(CO, 1)
    else:
        raise ValueError("PReLU alpha must be scalar or per-channel (CO,)")
    wpk = jnp.concatenate([w_mat, bias.reshape(CO, 1), alpha_col], axis=1)  # (CO, K+2)

    kernel = functools.partial(convres_kernel, C=C, CO=CO, Wp=Wp,
                               L_pad=L_pad, Nb=Nb)

    out_flat = pl.pallas_call(
        kernel,
        out_shape=jax.ShapeDtypeStruct((Npad, CO, L_pad), jnp.float32),
        grid_spec=pltpu.PrefetchScalarGridSpec(
            num_scalar_prefetch=0,
            grid=(G,),
            in_specs=[
                pl.BlockSpec((Nb, C, Lp_pad), lambda n: (n, 0, 0)),
                pl.BlockSpec((CO, K + 2), lambda n: (0, 0)),
            ],
            out_specs=pl.BlockSpec((Nb, CO, L_pad), lambda n: (n, 0, 0)),
        ),
        compiler_params=pltpu.CompilerParams(
            dimension_semantics=("parallel",)),
    )(x_flat, wpk)

    # (Npad, CO, L_pad) -> (N, CO, Ho, Wo): drop padded images/lanes, reshape
    # with the input row stride Wp, trim the Wp-Wo garbage right columns.
    # (A downstream Pallas consumer could instead accept the stride-Wp slab
    # directly and skip this extra HBM pass.)
    return out_flat[:N, :, :L].reshape(N, CO, Ho, Wp)[:, :, :, :Wo]


def _reference(x_nchw, gamma, beta, run_mean, run_var, w_oihw, bias, alpha):
    """Pure-JAX reference (eval-mode semantics) for validation."""
    xb = (x_nchw - run_mean[None, :, None, None]) / jnp.sqrt(
        run_var[None, :, None, None] + EPS)
    xb = xb * gamma[None, :, None, None] + beta[None, :, None, None]
    y = lax.conv_general_dilated(
        xb, w_oihw, window_strides=(1, 1),
        padding=((PAD, PAD), (PAD, PAD)),
        dimension_numbers=("NCHW", "OIHW", "NCHW"))
    y = y + bias[None, :, None, None]
    return jnp.where(y > 0, y, alpha * y)


if __name__ == "__main__":
    # Small shapes consistent with the module: ConvRes(insize=4, outsize=8).
    N, C, H, W = 2, 4, 16, 16
    CO = 8

    key = jax.random.PRNGKey(0)
    ks = jax.random.split(key, 8)
    x = jax.random.normal(ks[0], (N, C, H, W), jnp.float32)

    # Deterministic synthetic parameters (shapes from the module __init__).
    gamma = 1.0 + 0.1 * jax.random.normal(ks[1], (C,), jnp.float32)
    beta = 0.1 * jax.random.normal(ks[2], (C,), jnp.float32)
    run_mean = 0.1 * jax.random.normal(ks[3], (C,), jnp.float32)
    run_var = jax.random.uniform(ks[4], (C,), jnp.float32, 0.5, 1.5)
    w_oihw = 0.1 * jax.random.normal(ks[5], (CO, C, KH, KW), jnp.float32)
    bias = 0.1 * jax.random.normal(ks[6], (CO,), jnp.float32)
    alpha = jnp.asarray(0.25, jnp.float32)  # PReLU default init (num_parameters=1)

    out = convres_forward(x, gamma, beta, run_mean, run_var, w_oihw, bias, alpha)
    out = jax.block_until_ready(out)

    ref = _reference(x, gamma, beta, run_mean, run_var, w_oihw, bias, alpha)
    assert out.shape == (N, CO, H + 3, W + 3), out.shape
    assert jnp.allclose(out, ref, rtol=1e-4, atol=1e-4), "mismatch vs reference"

    print("KERNEL_OK")
</pallas_src>

<mosaic_0001>
module attributes {stable_mosaic.version = 11 : i64} {
  func.func @convres_kernel(%arg0: i32, %arg1: memref<1x4x512xf32, #tpu.memory_space<vmem>>, %arg2: memref<8x18xf32, #tpu.memory_space<vmem>>, %arg3: memref<1x8x384xf32, #tpu.memory_space<vmem>>) attributes {dimension_semantics = [#tpu.dimension_semantics<parallel>], iteration_bounds = array<i64: 2>, scalar_prefetch = 0 : i64, scratch_operands = 0 : i64, tpu.core_type = #tpu.core_type<tc>, window_params = [{transform_indices = @transform_0, window_bounds = array<i64: 1, 4, 512>}, {pipeline_mode = #tpu.pipeline_mode<synchronous>, transform_indices = @transform_1, window_bounds = array<i64: 8, 18>}, {transform_indices = @transform_2, window_bounds = array<i64: 1, 8, 384>}]} {
    %c0 = arith.constant 0 : index
    %c16 = arith.constant 16 : index
    %0 = vector.load %arg2[%c0, %c16] : memref<8x18xf32, #tpu.memory_space<vmem>>, vector<8x1xf32>
    %c0_0 = arith.constant 0 : index
    %c17 = arith.constant 17 : index
    %1 = vector.load %arg2[%c0_0, %c17] : memref<8x18xf32, #tpu.memory_space<vmem>>, vector<8x1xf32>
    %c0_1 = arith.constant 0 : index
    %c0_2 = arith.constant 0 : index
    %c0_3 = arith.constant 0 : index
    %2 = vector.load %arg1[%c0_1, %c0_2, %c0_3] : memref<1x4x512xf32, #tpu.memory_space<vmem>>, vector<1x4x384xf32>
    %3 = vector.shape_cast %2 : vector<1x4x384xf32> to vector<4x384xf32>
    %c0_4 = arith.constant 0 : index
    %c0_5 = arith.constant 0 : index
    %4 = vector.load %arg2[%c0_4, %c0_5] : memref<8x18xf32, #tpu.memory_space<vmem>>, vector<8x4xf32>
    %cst = arith.constant dense<0.000000e+00> : vector<8x384xf32>
    %5 = tpu.matmul %4, %3, %cst {dimension_numbers = #tpu.dot_dimension_numbers<[1], [0], [0], [1], [0, 0, 1, 1], [], []>} : vector<8x4xf32>, vector<4x384xf32>, vector<8x384xf32> -> vector<8x384xf32>
    %c0_6 = arith.constant 0 : index
    %c0_7 = arith.constant 0 : index
    %c1 = arith.constant 1 : index
    %6 = vector.load %arg1[%c0_6, %c0_7, %c1] : memref<1x4x512xf32, #tpu.memory_space<vmem>>, vector<1x4x384xf32>
    %7 = vector.shape_cast %6 : vector<1x4x384xf32> to vector<4x384xf32>
    %c0_8 = arith.constant 0 : index
    %c4 = arith.constant 4 : index
    %8 = vector.load %arg2[%c0_8, %c4] : memref<8x18xf32, #tpu.memory_space<vmem>>, vector<8x4xf32>
    %cst_9 = arith.constant dense<0.000000e+00> : vector<8x384xf32>
    %9 = tpu.matmul %8, %7, %cst_9 {dimension_numbers = #tpu.dot_dimension_numbers<[1], [0], [0], [1], [0, 0, 1, 1], [], []>} : vector<8x4xf32>, vector<4x384xf32>, vector<8x384xf32> -> vector<8x384xf32>
    %10 = arith.addf %5, %9 : vector<8x384xf32>
    %c0_10 = arith.constant 0 : index
    %c0_11 = arith.constant 0 : index
    %c20 = arith.constant 20 : index
    %11 = vector.load %arg1[%c0_10, %c0_11, %c20] : memref<1x4x512xf32, #tpu.memory_space<vmem>>, vector<1x4x384xf32>
    %12 = vector.shape_cast %11 : vector<1x4x384xf32> to vector<4x384xf32>
    %c0_12 = arith.constant 0 : index
    %c8 = arith.constant 8 : index
    %13 = vector.load %arg2[%c0_12, %c8] : memref<8x18xf32, #tpu.memory_space<vmem>>, vector<8x4xf32>
    %cst_13 = arith.constant dense<0.000000e+00> : vector<8x384xf32>
    %14 = tpu.matmul %13, %12, %cst_13 {dimension_numbers = #tpu.dot_dimension_numbers<[1], [0], [0], [1], [0, 0, 1, 1], [], []>} : vector<8x4xf32>, vector<4x384xf32>, vector<8x384xf32> -> vector<8x384xf32>
    %15 = arith.addf %10, %14 : vector<8x384xf32>
    %c0_14 = arith.constant 0 : index
    %c0_15 = arith.constant 0 : index
    %c21 = arith.constant 21 : index
    %16 = vector.load %arg1[%c0_14, %c0_15, %c21] : memref<1x4x512xf32, #tpu.memory_space<vmem>>, vector<1x4x384xf32>
    %17 = vector.shape_cast %16 : vector<1x4x384xf32> to vector<4x384xf32>
    %c0_16 = arith.constant 0 : index
    %c12 = arith.constant 12 : index
    %18 = vector.load %arg2[%c0_16, %c12] : memref<8x18xf32, #tpu.memory_space<vmem>>, vector<8x4xf32>
    %cst_17 = arith.constant dense<0.000000e+00> : vector<8x384xf32>
    %19 = tpu.matmul %18, %17, %cst_17 {dimension_numbers = #tpu.dot_dimension_numbers<[1], [0], [0], [1], [0, 0, 1, 1], [], []>} : vector<8x4xf32>, vector<4x384xf32>, vector<8x384xf32> -> vector<8x384xf32>
    %20 = arith.addf %15, %19 : vector<8x384xf32>
    %21 = vector.broadcast %0 : vector<8x1xf32> to vector<8x384xf32>
    %22 = arith.addf %20, %21 : vector<8x384xf32>
    %cst_18 = arith.constant 0.000000e+00 : f32
    %23 = vector.broadcast %cst_18 : f32 to vector<8x384xf32>
    %24 = arith.cmpf ogt, %22, %23 : vector<8x384xf32>
    %25 = vector.broadcast %1 : vector<8x1xf32> to vector<8x384xf32>
    %26 = arith.mulf %25, %22 : vector<8x384xf32>
    %27 = arith.select %24, %22, %26 : vector<8x384xi1>, vector<8x384xf32>
    %c0_19 = arith.constant 0 : index
    %c0_20 = arith.constant 0 : index
    %c0_21 = arith.constant 0 : index
    %28 = vector.load %arg3[%c0_19, %c0_20, %c0_21] : memref<1x8x384xf32, #tpu.memory_space<vmem>>, vector<1x8x384xf32>
    %29 = vector.shape_cast %28 : vector<1x8x384xf32> to vector<8x384xf32>
    %30 = vector.shape_cast %27 : vector<8x384xf32> to vector<1x8x384xf32>
    tpu.vector_store %arg3[%c0_19, %c0_20, %c0_21], %30 {strides = array<i32>} : memref<1x8x384xf32, #tpu.memory_space<vmem>>, vector<1x8x384xf32>,
    return
  }
  func.func @transform_0(%arg0: i32) -> (i32, i32, i32) {
    %c0_i32 = arith.constant 0 : i32
    %c0_i32_0 = arith.constant 0 : i32
    %c0_i32_1 = arith.constant 0 : i32
    return %arg0, %c0_i32, %c0_i32_0 : i32, i32, i32
  }
  func.func @transform_1(%arg0: i32) -> (i32, i32) {
    %c0_i32 = arith.constant 0 : i32
    %c0_i32_0 = arith.constant 0 : i32
    %c0_i32_1 = arith.constant 0 : i32
    return %c0_i32, %c0_i32_0 : i32, i32
  }
  func.func @transform_2(%arg0: i32) -> (i32, i32, i32) {
    %c0_i32 = arith.constant 0 : i32
    %c0_i32_0 = arith.constant 0 : i32
    %c0_i32_1 = arith.constant 0 : i32
    return %arg0, %c0_i32, %c0_i32_0 : i32, i32, i32
  }
}

</mosaic_0001>

<bundles_post_ra>
// kernel: convres_forward.1
= control target key start
LH: loop header
LB: loop body
LE: loop exit
PB: predicated region body
PF: predicated region fallthrough
CT: control target
= control target key end

     0   :  { %s1018_s9 = smov 0   ;;  %s1092_s0 = inlined_call_operand.vmem [shape: f32[2,4,512], index: 0, kind: input, shape index: {}]   ;;  %s1093_s1 = inlined_call_operand.vmem [shape: f32[8,18], index: 1, kind: input, shape index: {}]   ;;  %s1094_s2 = inlined_call_operand.vmem [shape: f32[2,8,384], index: 2, kind: output, shape index: {}]  }
   0x1 LB: > { %s897_s10 = sadd.s32 4294967295, %s991_s9   ;;  %p901_p0 = scmp.ge.s32.totalorder %s991_s9, 1  ;;  %s991_s9 = sphi %s1018_s9, %s12_s9  }
   0x2   : > { %p112_p1 = scmp.lt.s32.totalorder %s991_s9, 3 }
   0x4   : > { %p113_p2 = pnand %p901_p0, %p112_p1 }
   0x5   : > { %p134_p3 = scmp.lt.s32.totalorder (!%p113_p2), %s897_s10, 1  ;;  %v993_v0 = vmov (!%p113_p2), 0.0   ;;  %vm994_vm0 = vmmov (!%p113_p2), 0   ;;  %s995_s15 = smov (!%p113_p2), 127   ;;  %v1042_v3 = vld [vmem:[%s1093_s1] sm:$0xff] (!%p113_p2)  ;;  %v1000_v6 = vmov (!%p113_p2), 16  }
   0x6   : > { %116 = sbr.rel (%p113_p2) target bundleno = 384 (0x180), region = 28  ;;  %242 = vmatprep.mubr.f32.mxu0 (!%p113_p2), %v993_v0  ;;  %936 = vmatprep.subr.mxu1 (!%p113_p2), %v993_v0  ;;  %s996_s18 = smov (!%p113_p2), 124   ;;  %v1001_v7 = vmov (!%p113_p2), 17   ;;  %vm164_vm1 = vcmask (!%p113_p2), 1039360   ;;  %vm171_vm2 = vcmask (!%p113_p2), 1043456   ;;  %vm168_vm3 = vcmask (!%p113_p2), 31744  }
   0x7   : > { %938 = vmatprep.mubr.msk.f32.mxu1 (!%p113_p2), %vm994_vm0, %v993_v0  ;;  %s997_s19 = smov (!%p113_p2), 108   ;;  %s998_s20 = smov (!%p113_p2), 120   ;;  %981 = vset.pattern.permute.xlu1 (!%p113_p2), %v1000_v6  ;;  %vm489_vm4 = vcmask (!%p113_p2), 883712   ;;  %vm663_vm5 = vcmask (!%p113_p2), 875520  }
   0x8   : > { %s999_s21 = smov (!%p113_p2), 107   ;;  %982 = vset.pattern.permute.xlu0 (!%p113_p2), %v1001_v7  ;;  %s1002_s22 = smov (!%p113_p2), 116  }
   0xd   : > { %s1096_s10 = smov (!%p134_p3, %s897_s10), 1 }
   0xe   : > { %s927_s11 = sshll.u32 %s1096_s10, 4  ;;  %s962_s23 = smul.u32 24, %s1096_s10 }
   0xf   : > { %s1034_s14 = scalar_lea.vmem %s1092_s0, %s927_s11 }
  0x10   : > { %v147_v1 = vld [vmem:[%s1034_s14] sm:$0xff]  ;;  %v148_v4 = vld [vmem:[%s1034_s14 + $0x8] sm:$0xff]  ;;  %s143_s26 = scalar_lea.vmem %s1094_s2, %s962_s23 }
  0x11   : > { %156 = vrot.lane.b32.xlu1 %v147_v1, %s995_s15  ;;  %v154_v2 = vcombine.high %v147_v1, %v147_v1  ;;  %v155_v5 = vcombine.high %v148_v4, %v148_v4  ;;  %v146_v17 = vld [vmem:[%s1034_s14 + $0x8] sm:$0xf] }
  0x13   : > { %158 = vrot.lane.b32.xlu0 %v154_v2, %s995_s15 }
  0x15   : > { %150 = vrot.lane.b32.xlu1 %v1042_v3, %s996_s18 }
  0x17   : > { %160 = vrot.lane.b32.xlu0 %v148_v4, %s995_s15 }
  0x19   : > { %483 = vrot.lane.b32.xlu1 %v154_v2, %s997_s19 }
  0x1b   : > { %162 = vrot.lane.b32.xlu0 %v155_v5, %s995_s15 }
  0x1d   : > { %481 = vrot.lane.b32.xlu1 %v147_v1, %s997_s19 }
  0x1f   : > { %485 = vrot.lane.b32.xlu0 %v148_v4, %s997_s19 }
  0x21   : > { %487 = vrot.lane.b32.xlu1 %v155_v5, %s997_s19 }
  0x23   : > { %475 = vrot.lane.b32.xlu0 %v1042_v3, %s998_s20 }
  0x25   : > { %659 = vrot.lane.b32.xlu1 %v148_v4, %s999_s21 }
  0x27   : > { %657 = vrot.lane.b32.xlu0 %v154_v2, %s999_s21 }
  0x29   : > { %655 = vrot.lane.b32.xlu1 %v147_v1, %s999_s21 }
  0x2b   : > { %661 = vrot.lane.b32.xlu0 %v155_v5, %s999_s21 }
  0x2d   : > { %820 = vperm.xlu1 %981, %v1042_v3  }
  0x2f   : > { %649 = vrot.lane.b32.xlu0 %v1042_v3, %s1002_s22 }
  0x33   : > { %830 = vperm.xlu0 %982, %v1042_v3  }
  0x83   : > { %v157_v8 = vpop.permute.xlu1 %156 }
  0x85   : > { %v159_v9 = vpop.permute.xlu0 %158 }
  0x86   : > { %v165_v14 = vsel %vm164_vm1, %v157_v8, %v159_v9 }
  0x87   : > { %v151_v10 = vpop.permute.xlu1 %150 }
  0x89   : > { %v161_v11 = vpop.permute.xlu0 %160 }
  0x8a   : > { %v166_v12 = vsel %vm164_vm1, %v159_v9, %v161_v11 }
  0x8b   : > { %v484_v13 = vpop.permute.xlu1 %483  ;;  %905 = vmatprep.subr.msk.mxu0 %vm171_vm2, %v166_v12 }
  0x8c   : > { %906 = vmatpush1.msk.msra.mxu0 %vm171_vm2, %v165_v14 }
  0x8d   : > { %907 = vmatmul.mubr.msk.f32.vlgmr.msra.gmra.mrb[0].mxu0 %vm168_vm3, %v151_v10  ;;  %v163_v15 = vpop.permute.xlu0 %162  ;;  %910 = vmatprep.subr.msk.mxu0 %vm171_vm2, %v154_v2 }
  0x8e   : > { %911 = vmatpush1.msk.msra.mxu0 %vm171_vm2, %v147_v1  ;;  %v167_v16 = vsel %vm164_vm1, %v161_v11, %v163_v15  ;;  %394 = vmatprep.mubr.f32.mxu0 %v993_v0 }
  0x8f   : > { %v482_v18 = vpop.permute.xlu1 %481  ;;  %937 = vmatpush3.msk.msra.mxu1 %vm171_vm2, %v167_v16 }
  0x90   : > { %939 = vmatmul.mubr.msk.f32.vlgmr.msra.gmra.mrb[0].mxu1 %vm168_vm3, %v151_v10  ;;  %941 = vmatprep.subr.mxu1 %v993_v0  ;;  %v490_v21 = vsel %vm489_vm4, %v482_v18, %v484_v13 }
  0x91   : > { %v486_v19 = vpop.permute.xlu0 %485  ;;  %942 = vmatpush3.msk.msra.mxu1 %vm171_vm2, %v146_v17  ;;  %943 = vmatprep.mubr.msk.f32.mxu1 %vm994_vm0, %v993_v0 }
  0x92   : > { %v491_v20 = vsel %vm489_vm4, %v484_v13, %v486_v19  ;;  %946 = vmatprep.subr.mxu1 %v993_v0 }
  0x93   : > { %v488_v22 = vpop.permute.xlu1 %487  ;;  %915 = vmatprep.subr.msk.mxu0 %vm171_vm2, %v491_v20 }
  0x94   : > { %v492_v23 = vsel %vm489_vm4, %v486_v19, %v488_v22  ;;  %944 = vmatmul.mubr.msk.f32.vlgmr.msra.gmra.mrb[2].mxu1 %vm168_vm3, %v1042_v3 }
  0x95   : > { %v476_v24 = vpop.permute.xlu0 %475  ;;  %912 = vmatmul.mubr.msk.f32.vlgmr.msra.gmra.mrb[0].mxu0 %vm168_vm3, %v1042_v3  ;;  %947 = vmatpush3.msk.msra.mxu1 %vm171_vm2, %v492_v23 }
  0x96   : > { %916 = vmatpush1.msk.msra.mxu0 %vm171_vm2, %v490_v21  ;;  %948 = vmatprep.mubr.msk.f32.mxu1 %vm994_vm0, %v993_v0 }
  0x97   : > { %v660_v25 = vpop.permute.xlu1 %659  ;;  %565 = vmatprep.mubr.f32.mxu0 %v993_v0  ;;  %951 = vmatprep.subr.mxu1 %v993_v0 }
  0x98   : > { %949 = vmatmul.mubr.msk.f32.vlgmr.msra.gmra.mrb[4].mxu1 %vm168_vm3, %v476_v24 }
  0x99   : > { %v658_v26 = vpop.permute.xlu0 %657  ;;  %953 = vmatprep.mubr.msk.f32.mxu1 %vm994_vm0, %v993_v0 }
  0x9a   : > { %v665_v27 = vsel %vm663_vm5, %v658_v26, %v660_v25 }
  0x9b   : > { %v656_v28 = vpop.permute.xlu1 %655  ;;  %920 = vmatprep.subr.msk.mxu0 %vm171_vm2, %v665_v27 }
  0x9c   : > { %v664_v29 = vsel %vm663_vm5, %v656_v28, %v658_v26 }
  0x9d   : > { %v662_v30 = vpop.permute.xlu0 %661  ;;  %917 = vmatmul.mubr.msk.f32.vlgmr.msra.gmra.mrb[0].mxu0 %vm168_vm3, %v476_v24 }
  0x9e   : > { %v666_v31 = vsel %vm663_vm5, %v660_v25, %v662_v30  ;;  %921 = vmatpush1.msk.msra.mxu0 %vm171_vm2, %v664_v29  ;;  %739 = vmatprep.mubr.f32.mxu0 %v993_v0 }
  0x9f   : > { %952 = vmatpush3.msk.msra.mxu1 %vm171_vm2, %v666_v31 }
  0xa1   : > { %v650_v32 = vpop.permute.xlu0 %649 }
  0xa2   : > { %954 = vmatmul.mubr.msk.f32.vlgmr.msra.gmra.mrb[6].mxu1 %vm168_vm3, %v650_v32 }
  0xa5   : > { %922 = vmatmul.mubr.msk.f32.vlgmr.msra.gmra.mrb[0].mxu0 %vm168_vm3, %v650_v32 }
  0xac   : > { %v821_v42 = vpop.permute.xlu1 %820 }
  0xb2   : > { %v831_v45 = vpop.permute.xlu0 %830 }
 0x163   : > { %v315_v33 = vpop.f32.mrb[0].mxu1 }
 0x164   : > { %v940_v34 = vpop.f32.mrb[1].mxu1 }
 0x167   : > { %v467_v35 = vpop.f32.mrb[2].mxu1 }
 0x168   : > { %v468_v36 = vadd.f32 %v467_v35, %v315_v33  ;;  %v945_v37 = vpop.f32.mrb[3].mxu1 }
 0x16b   : > { %v638_v38 = vpop.f32.mrb[4].mxu1 }
 0x16c   : > { %v644_v39 = vadd.f32 %v638_v38, %v468_v36  ;;  %v950_v40 = vpop.f32.mrb[5].mxu1 }
 0x175   : > { %v812_v41 = vpop.f32.mrb[6].mxu1 }
 0x176   : > { %v818_v43 = vadd.f32 %v812_v41, %v644_v39  ;;  %v955_v44 = vpop.f32.mrb[7].mxu1 }
 0x178   : > { %v825_v46 = vadd.f32 %v821_v42, %v818_v43  ;;  %v741_v47 = vpop.f32.mrb[0].mxu0 }
 0x179   : > { %v823_v48 = vadd.f32 %v821_v42, %v741_v47  ;;  %v743_v49 = vpop.f32.mrb[1].mxu0 }
 0x17a   : > { %vm828_vm6 = vcmp.gt.f32.partialorder %v825_v46, 0.0  ;;  %v835_v50 = vmul.f32 %v831_v45, %v825_v46  ;;  %v824_v51 = vadd.f32 %v821_v42, %v743_v49 }
 0x17b   : > { %vm826_vm7 = vcmp.gt.f32.partialorder %v823_v48, 0.0  ;;  %v833_v52 = vmul.f32 %v831_v45, %v823_v48 }
 0x17c   : > { %v838_v53 = vsel %vm828_vm6, %v825_v46, %v835_v50  ;;  %vm827_vm8 = vcmp.gt.f32.partialorder %v824_v51, 0.0  ;;  %v834_v54 = vmul.f32 %v831_v45, %v824_v51 }
 0x17d   : > { %v836_v55 = vsel %vm826_vm7, %v823_v48, %v833_v52  ;;  %841 = vst [vmem:[%s143_s26 + $0x10] sm:$0xff] %v838_v53 }
 0x17e   : > { %839 = vst [vmem:[%s143_s26] sm:$0xff] %v836_v55  ;;  %v837_v56 = vsel %vm827_vm8, %v824_v51, %v834_v54 }
 0x17f   : > { %840 = vst [vmem:[%s143_s26 + $0x8] sm:$0xff] %v837_v56 }
 0x180 PF: > { %s12_s9 = sadd.s32 1, %s991_s9  }
 0x181   : > { %p9_p4 = scmp.ge.s32.totalorder %s12_s9, 4  }
 0x183   :  { %11 = sbr.rel (!%p9_p4) target bundleno = 1 (0x1), region = 58 }

</bundles_post_ra>
